<compile_context>
chip_gen: v7x
topology: tpu7x:2x2x1
jax: 0.10.0
libtpu: 0.0.40
codegen_flags: <defaults>
</compile_context>

<pallas_src>
import functools

import jax
import jax.numpy as jnp
from jax.experimental import pallas as pl
from jax.experimental.pallas import tpu as pltpu

_HIDDEN = 4  # nn.Linear(obs_dim, 4)
_OUT = 1     # nn.Linear(4, 1)
_DROP_P = 0.5

_TARGET_X_BYTES = 2 * 1024 * 1024   # ~2 MiB per streamed x buffer (v5e-safe)


def _round_up(n: int, m: int) -> int:
    return ((n + m - 1) // m) * m


def _round_down(n: int, m: int) -> int:
    return (n // m) * m


def _hash_u32(z):
    # splitmix32-style finalizer: cheap, portable (pure VPU integer ops),
    # good bit quality for a Bernoulli dropout mask.
    z = (z ^ (z >> 16)) * jnp.uint32(0x7FEB352D)
    z = (z ^ (z >> 15)) * jnp.uint32(0x846CA68B)
    z = z ^ (z >> 16)
    return z


def _mlp_kernel(seed_ref, x_ref, w1_ref, b1_ref, w2_ref, b2_ref, o_ref, *,
                training: bool, p: float, tile_b: int):
    # ---- Linear(obs_dim, 4) on the MXU, feature-major result --------------
    # x_ref: (tile_b, D) bf16 batch-major tile; w1_ref: (4, D) bf16 (PyTorch
    # weight layout).  Contract the D axes -> h: (4, tile_b) f32: batch lives
    # on the 128-lane axis, so all following elementwise work is lane-dense.
    h = jax.lax.dot_general(
        w1_ref[...], x_ref[...],
        dimension_numbers=(((1,), (1,)), ((), ())),
        preferred_element_type=jnp.float32,
    ) + b1_ref[...]                                   # (4, tile_b) + (4, 1)

    # ---- ReLU --------------------------------------------------------------
    h = jnp.maximum(h, 0.0)

    # ---- Dropout(p) (training mode only) -----------------------------------
    if training:
        # Counter-based hash RNG keyed on (seed, global row/col) so different
        # grid tiles never share a mask.  Works on real TPUs and under the
        # CPU interpreter.
        # TODO(synk): torch's dropout RNG stream is not bit-reproducible; only
        # the distribution (drop prob p, 1/(1-p) rescale of kept units) matches.
        col_off = (pl.program_id(0) * tile_b).astype(jnp.uint32)
        col = jax.lax.broadcasted_iota(jnp.int32, h.shape, 1).astype(jnp.uint32)
        row = jax.lax.broadcasted_iota(jnp.int32, h.shape, 0).astype(jnp.uint32)
        seed = seed_ref[0].astype(jnp.uint32)
        ctr = ((col + col_off) * jnp.uint32(0x9E3779B1)
               + row * jnp.uint32(0x85EBCA77)
               + seed * jnp.uint32(0xC2B2AE3D))
        bits = _hash_u32(ctr)
        keep = bits >= jnp.uint32(int(round(p * 2 ** 32)))   # P(keep) = 1 - p
        h = jnp.where(keep, h * jnp.float32(1.0 / (1.0 - p)), jnp.float32(0.0))
    # else: eval-mode dropout is identity.

    # ---- Linear(4, 1) as VPU multiply + 4-deep sublane reduce ---------------
    y = jnp.sum(h * w2_ref[...], axis=0, keepdims=True) + b2_ref[...]  # (1, tile_b)
    o_ref[...] = y.astype(o_ref.dtype)                                 # lane-dense store


def _pick_tile_b(batch: int, obs_dim: int, x_bytes_per_elem: int) -> int:
    """Byte-budgeted, lane-aligned batch tile."""
    rows = _TARGET_X_BYTES // max(1, x_bytes_per_elem * obs_dim)
    tile_b = max(128, _round_down(rows, 128))
    if batch > 256:
        # Guarantee >= 2 grid tiles so v7x's two TCs get work and the DMA
        # pipeline double-buffers.
        half = _round_up((batch + 1) // 2, 128)
        tile_b = min(tile_b, half)
    tile_b = min(tile_b, _round_up(max(batch, 1), 128))
    return max(tile_b, 128)


def function_f_forward(x, params, *, seed: int = 0, training: bool = False,
                       tile_b=None, p: float = _DROP_P):
    """function_f forward pass as a batch-tiled Pallas TPU kernel.

    params = (w1, b1, w2, b2) with shapes:
      w1: (4, obs_dim)  -- PyTorch nn.Linear(obs_dim, 4).weight layout
      b1: (4, 1)
      w2: (4, 1)        -- nn.Linear(4, 1).weight transposed (column)
      b2: (1, 1)
    """
    w1, b1, w2, b2 = params
    batch, obs_dim = x.shape
    assert 0.0 <= p < 1.0, "dropout p must be in [0, 1)"

    # Stream x and w1 in bf16 (halves HBM bytes + MXU weight-push cost);
    # accumulation and epilogue stay f32.
    x_stream = x.astype(jnp.bfloat16)
    w1_stream = w1.astype(jnp.bfloat16)
    x_bytes_per_elem = 2

    if tile_b is None:
        tile_b = _pick_tile_b(batch, obs_dim, x_bytes_per_elem)
    assert tile_b % 128 == 0
    b_pad = _round_up(batch, tile_b)
    if b_pad != batch:
        x_stream = jnp.pad(x_stream, ((0, b_pad - batch), (0, 0)))
    num_tiles = b_pad // tile_b

    seed_arr = jnp.array([seed], dtype=jnp.int32)
    kernel = functools.partial(_mlp_kernel, training=training, p=p,
                               tile_b=tile_b)

    # x BlockSpec: triple-buffer the only streaming operand when the grid is
    # deep enough (cheap VMEM after byte-budgeting; helps v7x's faster HBM).
    x_index_map = lambda i, seed: (i, 0)
    n_xbuf = 2
    if num_tiles >= 3:
        try:
            x_spec = pl.BlockSpec((tile_b, obs_dim), x_index_map,
                                  pipeline_mode=pl.Buffered(3))
            n_xbuf = 3
        except (TypeError, AttributeError):
            x_spec = pl.BlockSpec((tile_b, obs_dim), x_index_map)
    else:
        x_spec = pl.BlockSpec((tile_b, obs_dim), x_index_map)

    # Explicit VMEM budget from the computed footprint (+ headroom).
    vmem_bytes = (n_xbuf * tile_b * obs_dim * x_bytes_per_elem          # x buffers
                  + 2 * tile_b * 4                                      # out buffers
                  + 2 * (_HIDDEN * obs_dim * x_bytes_per_elem           # w1
                         + 4 * (_HIDDEN + _HIDDEN + 1)))                # b1, w2, b2
    vmem_limit = min(max(vmem_bytes + (4 << 20), 8 << 20), 100 << 20)

    flops = 2 * b_pad * obs_dim * _HIDDEN + 3 * b_pad * _HIDDEN
    bytes_accessed = (x_bytes_per_elem * (b_pad * obs_dim + _HIDDEN * obs_dim)
                      + 4 * (b_pad + 2 * _HIDDEN + 1))

    out = pl.pallas_call(
        kernel,
        out_shape=jax.ShapeDtypeStruct((1, b_pad), jnp.float32),
        grid_spec=pltpu.PrefetchScalarGridSpec(
            num_scalar_prefetch=1,                    # seed -> SMEM
            grid=(num_tiles,),
            in_specs=[
                x_spec,                                                      # x tile (bf16)
                pl.BlockSpec((_HIDDEN, obs_dim), lambda i, seed: (0, 0)),    # w1 (resident, bf16)
                pl.BlockSpec((_HIDDEN, 1), lambda i, seed: (0, 0)),          # b1
                pl.BlockSpec((_HIDDEN, 1), lambda i, seed: (0, 0)),          # w2
                pl.BlockSpec((1, 1), lambda i, seed: (0, 0)),                # b2
            ],
            out_specs=pl.BlockSpec((1, tile_b), lambda i, seed: (0, i)),     # lane-dense
        ),
        compiler_params=pltpu.CompilerParams(
            dimension_semantics=("parallel",),        # 2-TC sharding on v7x
            vmem_limit_bytes=vmem_limit,
        ),
        cost_estimate=pl.CostEstimate(
            flops=flops, transcendentals=0, bytes_accessed=bytes_accessed),
    )(seed_arr, x_stream, w1_stream, b1, w2, b2)

    return out[0, :batch].reshape(batch, 1)


def init_params(key, obs_dim: int, hidden: int = _HIDDEN, out: int = _OUT):
    """Deterministic init mimicking nn.Linear's U(-1/sqrt(fan_in), 1/sqrt(fan_in))."""
    k1, k2, k3, k4 = jax.random.split(key, 4)
    lim1 = 1.0 / jnp.sqrt(obs_dim)
    lim2 = 1.0 / jnp.sqrt(hidden)
    w1 = jax.random.uniform(k1, (hidden, obs_dim), jnp.float32, -lim1, lim1)
    b1 = jax.random.uniform(k2, (hidden, 1), jnp.float32, -lim1, lim1)
    w2 = jax.random.uniform(k3, (hidden, out), jnp.float32, -lim2, lim2)
    b2 = jax.random.uniform(k4, (out, 1), jnp.float32, -lim2, lim2)
    return w1, b1, w2, b2


def _reference_eval(x, params):
    # Matches the kernel's numerics: bf16 operands into the matmul, f32
    # accumulation, f32 epilogue; dropout = identity (eval mode).
    w1, b1, w2, b2 = params
    h = jnp.dot(x.astype(jnp.bfloat16), w1.T.astype(jnp.bfloat16),
                preferred_element_type=jnp.float32) + b1[:, 0][None, :]
    h = jnp.maximum(h, 0.0)
    return h @ w2 + b2                                    # (B, 1)


if __name__ == "__main__":
    batch, obs_dim = 8, 32
    key = jax.random.PRNGKey(0)
    kx, kp, kx2 = jax.random.split(key, 3)

    x = jax.random.normal(kx, (batch, obs_dim), dtype=jnp.float32)
    params = init_params(kp, obs_dim)

    # Eval-mode forward: must match the bf16-matmul / f32-accumulate reference.
    out_eval = function_f_forward(x, params, training=False)
    jax.block_until_ready(out_eval)
    ref = _reference_eval(x, params)
    assert out_eval.shape == (batch, 1)
    assert jnp.allclose(out_eval, ref, atol=1e-4, rtol=1e-4), "eval-mode mismatch"

    # Multi-tile grid path (padding + several grid steps, triple-buffered x),
    # still eval mode.
    batch2 = 300
    x2 = jax.random.normal(kx2, (batch2, obs_dim), dtype=jnp.float32)
    out2 = function_f_forward(x2, params, training=False, tile_b=128)
    jax.block_until_ready(out2)
    ref2 = _reference_eval(x2, params)
    assert out2.shape == (batch2, 1)
    assert jnp.allclose(out2, ref2, atol=1e-4, rtol=1e-4), "multi-tile mismatch"

    # Auto tile selection path (byte budget + >=2-tile cap), eval mode.
    out3 = function_f_forward(x2, params, training=False)
    jax.block_until_ready(out3)
    assert out3.shape == (batch2, 1)
    assert jnp.allclose(out3, ref2, atol=1e-4, rtol=1e-4), "auto-tile mismatch"

    # Training-mode forward (stochastic dropout, p=0.5, x2 rescale of kept units).
    out_train = function_f_forward(x, params, seed=1234, training=True)
    jax.block_until_ready(out_train)
    assert out_train.shape == (batch, 1)
    assert bool(jnp.all(jnp.isfinite(out_train)))

    print("KERNEL_OK")
</pallas_src>

<mosaic_0001>
module attributes {stable_mosaic.version = 11 : i64} {
  func.func @_mlp_kernel(%arg0: i32, %arg1: memref<1xi32, #tpu.memory_space<smem>>, %arg2: memref<128x32xbf16, #tpu.memory_space<vmem>>, %arg3: memref<4x32xbf16, #tpu.memory_space<vmem>>, %arg4: memref<4x1xf32, #tpu.memory_space<vmem>>, %arg5: memref<4x1xf32, #tpu.memory_space<vmem>>, %arg6: memref<1x1xf32, #tpu.memory_space<vmem>>, %arg7: memref<1x128xf32, #tpu.memory_space<vmem>>) attributes {dimension_semantics = [#tpu.dimension_semantics<parallel>], iteration_bounds = array<i64: 1>, scalar_prefetch = 1 : i64, scratch_operands = 0 : i64, tpu.core_type = #tpu.core_type<tc>, window_params = [{transform_indices = @transform_0, window_bounds = array<i64: 128, 32>}, {pipeline_mode = #tpu.pipeline_mode<synchronous>, transform_indices = @transform_1, window_bounds = array<i64: 4, 32>}, {pipeline_mode = #tpu.pipeline_mode<synchronous>, transform_indices = @transform_2, window_bounds = array<i64: 4, 1>}, {pipeline_mode = #tpu.pipeline_mode<synchronous>, transform_indices = @transform_3, window_bounds = array<i64: 4, 1>}, {pipeline_mode = #tpu.pipeline_mode<synchronous>, transform_indices = @transform_4, window_bounds = array<i64: 1, 1>}, {transform_indices = @transform_5, window_bounds = array<i64: 1, 128>}]} {
    %c0 = arith.constant 0 : index
    %c0_0 = arith.constant 0 : index
    %0 = vector.load %arg3[%c0, %c0_0] : memref<4x32xbf16, #tpu.memory_space<vmem>>, vector<4x32xbf16>
    %c0_1 = arith.constant 0 : index
    %c0_2 = arith.constant 0 : index
    %1 = vector.load %arg2[%c0_1, %c0_2] : memref<128x32xbf16, #tpu.memory_space<vmem>>, vector<128x32xbf16>
    %cst = arith.constant dense<0.000000e+00> : vector<4x128xf32>
    %2 = tpu.matmul %0, %1, %cst {dimension_numbers = #tpu.dot_dimension_numbers<[1], [1], [0], [0], [0, 0, 1, 0], [], []>} : vector<4x32xbf16>, vector<128x32xbf16>, vector<4x128xf32> -> vector<4x128xf32>
    %c0_3 = arith.constant 0 : index
    %c0_4 = arith.constant 0 : index
    %3 = vector.load %arg4[%c0_3, %c0_4] : memref<4x1xf32, #tpu.memory_space<vmem>>, vector<4x1xf32>
    %4 = vector.broadcast %3 : vector<4x1xf32> to vector<4x128xf32>
    %5 = arith.addf %2, %4 : vector<4x128xf32>
    %cst_5 = arith.constant 0.000000e+00 : f32
    %6 = vector.broadcast %cst_5 : f32 to vector<4x128xf32>
    %7 = arith.maximumf %5, %6 : vector<4x128xf32>
    %c0_6 = arith.constant 0 : index
    %c0_7 = arith.constant 0 : index
    %8 = vector.load %arg5[%c0_6, %c0_7] : memref<4x1xf32, #tpu.memory_space<vmem>>, vector<4x1xf32>
    %9 = vector.broadcast %8 : vector<4x1xf32> to vector<4x128xf32>
    %10 = arith.mulf %7, %9 : vector<4x128xf32>
    %cst_8 = arith.constant dense<0.000000e+00> : vector<128xf32>
    %11 = vector.multi_reduction <add>, %10, %cst_8 [0] : vector<4x128xf32> to vector<128xf32>
    %12 = vector.shape_cast %11 : vector<128xf32> to vector<1x128xf32>
    %c0_9 = arith.constant 0 : index
    %c0_10 = arith.constant 0 : index
    %13 = vector.load %arg6[%c0_9, %c0_10] : memref<1x1xf32, #tpu.memory_space<vmem>>, vector<1x1xf32>
    %14 = vector.broadcast %13 : vector<1x1xf32> to vector<1x128xf32>
    %15 = arith.addf %12, %14 : vector<1x128xf32>
    %c0_11 = arith.constant 0 : index
    %c0_12 = arith.constant 0 : index
    %16 = vector.load %arg7[%c0_11, %c0_12] : memref<1x128xf32, #tpu.memory_space<vmem>>, vector<1x128xf32>
    tpu.vector_store %arg7[%c0_11, %c0_12], %15 {strides = array<i32>} : memref<1x128xf32, #tpu.memory_space<vmem>>, vector<1x128xf32>,
    return
  }
  func.func @transform_0(%arg0: i32, %arg1: memref<1xi32, #tpu.memory_space<smem>>) -> (i32, i32) {
    %c0_i32 = arith.constant 0 : i32
    %c0_i32_0 = arith.constant 0 : i32
    return %arg0, %c0_i32 : i32, i32
  }
  func.func @transform_1(%arg0: i32, %arg1: memref<1xi32, #tpu.memory_space<smem>>) -> (i32, i32) {
    %c0_i32 = arith.constant 0 : i32
    %c0_i32_0 = arith.constant 0 : i32
    %c0_i32_1 = arith.constant 0 : i32
    return %c0_i32, %c0_i32_0 : i32, i32
  }
  func.func @transform_2(%arg0: i32, %arg1: memref<1xi32, #tpu.memory_space<smem>>) -> (i32, i32) {
    %c0_i32 = arith.constant 0 : i32
    %c0_i32_0 = arith.constant 0 : i32
    %c0_i32_1 = arith.constant 0 : i32
    return %c0_i32, %c0_i32_0 : i32, i32
  }
  func.func @transform_3(%arg0: i32, %arg1: memref<1xi32, #tpu.memory_space<smem>>) -> (i32, i32) {
    %c0_i32 = arith.constant 0 : i32
    %c0_i32_0 = arith.constant 0 : i32
    %c0_i32_1 = arith.constant 0 : i32
    return %c0_i32, %c0_i32_0 : i32, i32
  }
  func.func @transform_4(%arg0: i32, %arg1: memref<1xi32, #tpu.memory_space<smem>>) -> (i32, i32) {
    %c0_i32 = arith.constant 0 : i32
    %c0_i32_0 = arith.constant 0 : i32
    %c0_i32_1 = arith.constant 0 : i32
    return %c0_i32, %c0_i32_0 : i32, i32
  }
  func.func @transform_5(%arg0: i32, %arg1: memref<1xi32, #tpu.memory_space<smem>>) -> (i32, i32) {
    %c0_i32 = arith.constant 0 : i32
    %c0_i32_0 = arith.constant 0 : i32
    return %c0_i32, %arg0 : i32, i32
  }
}

</mosaic_0001>

<bundles_post_ra>
// kernel: tpu_custom_call.1
= control target key start
LH: loop header
LB: loop body
LE: loop exit
PB: predicated region body
PF: predicated region fallthrough
CT: control target
= control target key end

     0   :  { %s371_s0 = inlined_call_operand.<no memory space> [shape: s32[1], index: 0, kind: input, shape index: {}]   ;;  %s372_s1 = inlined_call_operand.vmem [shape: bf16[128,32], index: 1, kind: input, shape index: {}]   ;;  %s373_s2 = inlined_call_operand.vmem [shape: bf16[4,32], index: 2, kind: input, shape index: {}]   ;;  %s374_s3 = inlined_call_operand.vmem [shape: f32[4,1], index: 3, kind: input, shape index: {}]   ;;  %s375_s4 = inlined_call_operand.vmem [shape: f32[4,1], index: 4, kind: input, shape index: {}]   ;;  %s376_s5 = inlined_call_operand.<no memory space> [shape: f32[1,1], index: 5, kind: input, shape index: {}]   ;;  %s377_s6 = inlined_call_operand.hbm [shape: f32[1,128], index: 6, kind: output, shape index: {}]  }
   0x1   :  { %v12_v0 = vstv %s376_s5 }
   0x2   :  { %13 = vst [vmem:[#allocation4] sm:$0x1] %v12_v0 }
   0x3   :  { %v243_v1 = vld [vmem:[%s372_s1] sm:$0xff]   ;;  %v275_v2 = vmov 0.0   ;;  %vm89_vm0 = vcmask 261120   ;;  %v244_v4 = vld [vmem:[%s372_s1 + $0x8] sm:$0xff]   ;;  %vm276_vm1 = vmmov 0   ;;  %v277_v6 = vmov 0  }
   0x4   :  { %217 = vmatprep.subr.bf16.mxu0 %v275_v2  ;;  %v94_v3 = vsel %vm89_vm0, %v243_v1, 0  ;;  %v97_v5 = vsel %vm89_vm0, %v244_v4, 0  ;;  %233 = vmatprep.mubr.msk.bf16.mxu0 %vm276_vm1, %v275_v2  ;;  %v43_v7 = vld [vmem:[%s374_s3] sm:$0xf] }
   0x5   :  { %218 = vmatpush3.bf16.xpose.msra.mxu0 %v94_v3  ;;  %241 = vset.pattern.permute.xlu0 %v277_v6 }
   0x6   :  { %219 = vmatprep.subr.bf16.mxu0 %v275_v2  ;;  %46 = vperm.xlu0 %241, %v43_v7  }
   0x7   :  { %242 = vset.pattern.permute.xlu1 %v277_v6 }
   0x9   :  { %v173_v8 = vld [vmem:[#allocation4] sm:$0x1] }
   0xa   :  { %14 = vsyncpa [#allocation6], 0  ;;  %v158_v9 = vld [vmem:[%s375_s4] sm:$0xf]  ;;  %176 = vperm.xlu1 %242, %v173_v8   ;;  %v245_v10 = vld [vmem:[%s372_s1 + $0x10] sm:$0xff]   ;;  %vm165_vm2 = vcmask 1043456   ;;  %v179_v31 = vlaneseq }
   0xb   :  { %161 = vperm.xlu0 %241, %v158_v9   ;;  %v100_v11 = vsel %vm89_vm0, %v245_v10, 0  ;;  %v246_v12 = vld [vmem:[%s372_s1 + $0x18] sm:$0xff]   ;;  %v247_v14 = vld [vmem:[%s372_s1 + $0x20] sm:$0xff]   ;;  %v248_v16 = vld [vmem:[%s372_s1 + $0x28] sm:$0xff]  }
   0xc   :  { %v103_v13 = vsel %vm89_vm0, %v246_v12, 0  ;;  %v106_v15 = vsel %vm89_vm0, %v247_v14, 0  ;;  %v109_v17 = vsel %vm89_vm0, %v248_v16, 0  ;;  %v249_v18 = vld [vmem:[%s372_s1 + $0x30] sm:$0xff]   ;;  %v250_v20 = vld [vmem:[%s372_s1 + $0x38] sm:$0xff]   ;;  %v180_v35 = vshrl.u32 %v179_v31, 7 }
   0xd   :  { %220 = vmatpush3.bf16.xpose.msra.mxu0 %v97_v5  ;;  %v112_v19 = vsel %vm89_vm0, %v249_v18, 0  ;;  %v115_v21 = vsel %vm89_vm0, %v250_v20, 0  ;;  %v26_v22 = vld [vmem:[%s373_s2] sm:$0x3]  ;;  %s278_s1 = smov [#allocation5]  }
   0xe   :  { %221 = vmatprep.subr.bf16.mxu0 %v275_v2  ;;  %v181_v38 = vsub.s32 0, %v180_v35  ;;  %s191_s2 = sshll.u32 %s278_s1, 4  ;;  %s192_s2 = int_to_ptr.vmem [resolvable:$true] %s191_s2 }
   0xf   :  { %s251_s17 = scalar_lea.vmem %s192_s2, 16  ;;  %s255_s18 = scalar_lea.vmem %s192_s2, 32 }
  0x10   :  { %p252_p0 = scmp.ne.s32.totalorder %s192_s2, %s251_s17  ;;  %p256_p1 = scmp.lt.s32.totalorder %s192_s2, %s192_s2 }
  0x11   :  { %p257_p2 = scmp.lt.s32.totalorder %s255_s18, %s251_s17 }
  0x13   :  { %p258_p3 = por %p257_p2, %p256_p1 }
  0x15   :  { %222 = vmatpush3.bf16.xpose.msra.mxu0 %v100_v11  ;;  %p259_p4 = pnand %p258_p3, %p252_p0 }
  0x16   :  { %223 = vmatprep.subr.bf16.mxu0 %v275_v2 }
  0x1d   :  { %224 = vmatpush3.bf16.xpose.msra.mxu0 %v103_v13 }
  0x1e   :  { %225 = vmatprep.subr.bf16.mxu0 %v275_v2 }
  0x25   :  { %226 = vmatpush3.bf16.xpose.msra.mxu0 %v106_v15 }
  0x26   :  { %227 = vmatprep.subr.bf16.mxu0 %v275_v2 }
  0x2d   :  { %228 = vmatpush3.bf16.xpose.msra.mxu0 %v109_v17 }
  0x2e   :  { %229 = vmatprep.subr.bf16.mxu0 %v275_v2 }
  0x35   :  { %230 = vmatpush3.bf16.xpose.msra.mxu0 %v112_v19 }
  0x36   :  { %231 = vmatprep.subr.bf16.mxu0 %v275_v2 }
  0x3d   :  { %232 = vmatpush3.bf16.xpose.msra.mxu0 %v115_v21 }
  0x44   :  { %234 = vmatmul.mubr.msk.bf16.vlgmr.msra.gmra.mrb[0].mxu0 %vm89_vm0, %v26_v22 }
  0x85   :  { %v47_v23 = vpop.permute.xlu0 %46 }
  0x89   :  { %v177_v39 = vpop.permute.xlu1 %176 }
  0x8a   :  { %v162_v30 = vpop.permute.xlu0 %161  ;;  %v182_v41 = vrot.slane %v177_v39, %v181_v38 }
 0x117   :  { %v151_v24 = vpop.f32.mrb[0].mxu0 }
 0x118   :  { %v152_v25 = vadd.f32 %v151_v24, %v47_v23  ;;  %v235_v26 = vpop.f32.mrb[1].mxu0 }
 0x119   :  { %v154_v27 = vpop.f32.mrb[2].mxu0 }
 0x11a   :  { %v157_v28 = vmax.f32 %v152_v25, 0.0  ;;  %v236_v29 = vpop.f32.mrb[3].mxu0 }
 0x11c   :  { %v164_v32 = vmul.f32 %v162_v30, %v157_v28 }
 0x11e   :  { %v166_v33 = vsel %vm165_vm2, %v164_v32, 0.0 }
 0x11f   :  { %v167_v34 = vrot.slane %v166_v33, 4 }
 0x121   :  { %v168_v36 = vadd.f32 %v167_v34, %v166_v33 }
 0x123   :  { %v169_v37 = vrot.slane %v168_v36, 2 }
 0x125   :  { %v170_v40 = vadd.f32 %v169_v37, %v168_v36 }
 0x127   :  { %v171_v42 = vrot.slane %v170_v40, 1 }
 0x129   :  { %v172_v43 = vadd.f32 %v171_v42, %v170_v40 }
 0x12b   :  { %v183_v44 = vadd.f32 %v182_v41, %v172_v43 }
 0x12d   :  { %184 = vst [vmem:[#allocation5] sm:$0x1] %v183_v44 }
 0x12e   :  { %262 = shalt.err (!%p259_p4)
}
 0x12f   :  { %s263_s21 = scalar_lea.hbm %s377_s6, 16 }
 0x130   :  { %p264_p5 = scmp.ne.s32.totalorder %s377_s6, %s263_s21  ;;  %p267_p6 = scmp.lt.u32.totalorder %s263_s21, %s377_s6 }
 0x132   :  { %p269_p7 = pnand %p267_p6, %p264_p5 }
 0x134   :  { %272 = shalt.err (!%p269_p7)
}
 0x135   :  { %194 = dma.vmem_to_hbm [thread:$0]  %s192_s2, 16, %s377_s6, [#allocation6]  }
 0x136   :  { %273 = dma.done.wait [#allocation6], 16  }
 0x137   :  { %274 = vsyncadd [#allocation6], 4294967280 }
 0x138   :  { %198 = vsyncpa [#allocation6], 1 }

</bundles_post_ra>
